<compile_context>
chip_gen: v5e
topology: v5e:2x2
jax: 0.10.0
libtpu: 0.0.40
codegen_flags: <defaults>
</compile_context>

<pallas_src>
import jax
import jax.numpy as jnp
from jax import lax
from jax.experimental import pallas as pl
from jax.experimental.pallas import tpu as pltpu

LN_EPS = 1e-5  # nn.LayerNorm default eps


# --------------------------------------------------------------------------------------
# Kernel
# --------------------------------------------------------------------------------------
def residual_mlp_kernel(x_ref, w1_ref, w2_ref, aff_ref, o_ref):
    # x_ref:   (bm, in_dim)          input tile (pipelined over batch)
    # w1_ref:  (in_dim, out_dim)     bf16, [K, N] layout (resident)
    # w2_ref:  (out_dim, out_dim)    bf16, [K, N] layout (resident)
    # aff_ref: (4, out_dim) f32      rows = [b1, b2, gamma, beta]
    # o_ref:   (bm, out_dim)
    b1 = aff_ref[0:1, :]
    b2 = aff_ref[1:2, :]
    gamma = aff_ref[2:3, :]
    beta = aff_ref[3:4, :]

    # linear1 on the MXU: native [M,K]x[K,N], bf16 operands, f32 accumulation.
    x = x_ref[...].astype(jnp.bfloat16)
    residual = jnp.dot(x, w1_ref[...], preferred_element_type=jnp.float32) + b1

    # LayerNorm over the feature (lane) axis, one-pass moments (independent reductions).
    inv_n = 1.0 / residual.shape[-1]
    mean = jnp.sum(residual, axis=-1, keepdims=True) * inv_n
    mean_sq = jnp.sum(residual * residual, axis=-1, keepdims=True) * inv_n
    var = jnp.maximum(mean_sq - mean * mean, 0.0)        # guard tiny cancellation
    scale = gamma * lax.rsqrt(var + LN_EPS)              # rsqrt -> EUP slot
    h = jnp.maximum((residual - mean) * scale + beta, 0.0)  # affine LN + ReLU

    # linear2 on the MXU (activations cast to bf16 just for the dot; accumulate f32).
    out = jnp.dot(h.astype(jnp.bfloat16), w2_ref[...], preferred_element_type=jnp.float32) + b2

    o_ref[...] = (residual + out).astype(o_ref.dtype)


# --------------------------------------------------------------------------------------
# One-time helpers (outside the hot wrapper path)
# --------------------------------------------------------------------------------------
_BUFFERED1_SUPPORTED = None


def _buffered_one_supported():
    """One-time cached probe: does this JAX build accept pipeline_mode=pl.Buffered(1)?"""
    global _BUFFERED1_SUPPORTED
    if _BUFFERED1_SUPPORTED is None:
        try:
            def _copy(a_ref, o_ref):
                o_ref[...] = a_ref[...]

            a = jnp.zeros((8, 128), jnp.float32)
            out = pl.pallas_call(
                _copy,
                out_shape=jax.ShapeDtypeStruct((8, 128), jnp.float32),
                grid=(1,),
                in_specs=[pl.BlockSpec((8, 128), lambda i: (0, 0),
                                       pipeline_mode=pl.Buffered(1))],
                out_specs=pl.BlockSpec((8, 128), lambda i: (0, 0)),
            )(a)
            jax.block_until_ready(out)
            _BUFFERED1_SUPPORTED = True
        except Exception:
            # Feature missing in this JAX build -> fall back to default double-buffering.
            _BUFFERED1_SUPPORTED = False
    return _BUFFERED1_SUPPORTED


def _tpu_vmem_capacity_bytes():
    try:
        return int(pltpu.get_tpu_info().vmem_capacity_bytes)
    except Exception:
        return 64 * 1024 * 1024  # conservative default (v7x per-TensorCore VMEM)


def _pick_bm(B, vmem_bytes):
    """Batch tile size. Bigger tiles on 128-MiB-VMEM chips (v5e/v6e); even tile count when
    the batch is large so v7x's two TensorCores stay balanced under 'parallel' sharding."""
    cap = 512 if vmem_bytes >= (96 << 20) else 256
    if B <= 16:
        return B  # too small to split usefully
    if B <= cap:
        bm = (B + 1) // 2  # >=2 tiles: DMA/compute overlap + 2-TC sharding on v7x
        return max(8, ((bm + 7) // 8) * 8)
    tiles = -(-B // cap)
    if tiles % 2:
        tiles += 1  # even tile count -> balanced across v7x's 2 TensorCores
    bm = -(-B // tiles)
    return max(8, ((bm + 7) // 8) * 8)


def prepare_params(w1, b1, w2, b2, gamma, beta):
    """One-time conversion from PyTorch parameter layouts to kernel layouts.

    nn.Linear stores weights as (out, in); transpose ONCE here to [K, N] and cast to bf16 so the
    kernel never pays a per-grid-step transpose. Pack b1/b2/gamma/beta into one (4, out_dim) tile.
    """
    out_dim = w1.shape[0]
    w1_kn = jnp.asarray(w1).T.astype(jnp.bfloat16)     # (in_dim, out_dim)
    w2_kn = jnp.asarray(w2).T.astype(jnp.bfloat16)     # (out_dim, out_dim), K-major
    aff = jnp.stack([
        jnp.asarray(b1, jnp.float32).reshape(out_dim),
        jnp.asarray(b2, jnp.float32).reshape(out_dim),
        jnp.asarray(gamma, jnp.float32).reshape(out_dim),
        jnp.asarray(beta, jnp.float32).reshape(out_dim),
    ]).astype(jnp.float32)                             # (4, out_dim)
    return w1_kn, w2_kn, aff


# --------------------------------------------------------------------------------------
# Wrapper
# --------------------------------------------------------------------------------------
def residual_mlp(x, w1_kn, w2_kn, aff, *, bm=None, out_dtype=None):
    """x: (B, in_dim); w1_kn: (in_dim, out_dim) bf16; w2_kn: (out_dim, out_dim) bf16 K-major;
    aff: (4, out_dim) f32 rows = [b1, b2, gamma, beta] (see prepare_params)."""
    B, in_dim = x.shape
    out_dim = w1_kn.shape[1]
    out_dtype = x.dtype if out_dtype is None else jnp.dtype(out_dtype)

    phys_vmem = _tpu_vmem_capacity_bytes()
    if bm is None:
        bm = _pick_bm(B, phys_vmem)
    bm = min(bm, B)
    grid = (pl.cdiv(B, bm),)

    use_buf1 = _buffered_one_supported()
    weight_bufs = 1 if use_buf1 else 2
    kw = {"pipeline_mode": pl.Buffered(1)} if use_buf1 else {}

    # Accurate VMEM budget (no double-counting), capped per generation with headroom.
    weight_bytes = weight_bufs * 2 * (in_dim * out_dim + out_dim * out_dim)           # bf16 W1+W2
    aff_bytes = weight_bufs * 8 * out_dim * 4                                          # (4,N)->8 sublanes
    act_bytes = 2 * bm * (in_dim * x.dtype.itemsize + out_dim * out_dtype.itemsize)    # dbl-buffered x/o
    inter_bytes = 2 * bm * out_dim * 4                                                 # residual + h (f32)
    est = weight_bytes + aff_bytes + act_bytes + inter_bytes + (4 << 20)               # + headroom
    vmem_cap = int(phys_vmem * 0.82)   # ~52 MiB on v7x (64 MiB phys), ~105 MiB on v5e/v6e (128 MiB)
    vmem_limit = int(min(max(est, 24 << 20), vmem_cap))
    # TODO(synk): for large layers where resident bf16 W1+W2 exceed ~60% of vmem_cap, add a grid
    # axis tiling linear2's output columns / linear1's K (streamed, double-buffered weight tiles)
    # with a f32 VMEM accumulator + pl.when init/finalize instead of fully-resident weights.

    flops = 2 * B * in_dim * out_dim + 2 * B * out_dim * out_dim
    bytes_accessed = (x.size * x.dtype.itemsize + w1_kn.size * 2 + w2_kn.size * 2
                      + aff.size * 4 + B * out_dim * out_dtype.itemsize)
    cost = pl.CostEstimate(flops=flops, transcendentals=B, bytes_accessed=bytes_accessed)

    return pl.pallas_call(
        residual_mlp_kernel,
        out_shape=jax.ShapeDtypeStruct((B, out_dim), out_dtype),
        grid_spec=pltpu.PrefetchScalarGridSpec(
            num_scalar_prefetch=0,
            grid=grid,
            in_specs=[
                pl.BlockSpec((bm, in_dim), lambda i: (i, 0)),                # x tile (pipelined)
                pl.BlockSpec((in_dim, out_dim), lambda i: (0, 0), **kw),     # W1 [K,N], resident
                pl.BlockSpec((out_dim, out_dim), lambda i: (0, 0), **kw),    # W2 [K,N], resident
                pl.BlockSpec((4, out_dim), lambda i: (0, 0), **kw),          # packed b1,b2,gamma,beta
            ],
            out_specs=pl.BlockSpec((bm, out_dim), lambda i: (i, 0)),
        ),
        compiler_params=pltpu.CompilerParams(
            dimension_semantics=("parallel",),
            vmem_limit_bytes=vmem_limit,
        ),
        cost_estimate=cost,
    )(x, w1_kn, w2_kn, aff)


# --------------------------------------------------------------------------------------
# Pure-JAX reference (matches the PyTorch module)
# --------------------------------------------------------------------------------------
def reference(x, w1, b1, w2, b2, gamma, beta):
    residual = x @ w1.T + b1
    mean = jnp.mean(residual, axis=-1, keepdims=True)
    var = jnp.mean((residual - mean) ** 2, axis=-1, keepdims=True)
    normed = (residual - mean) / jnp.sqrt(var + LN_EPS) * gamma + beta
    out = jnp.maximum(normed, 0.0) @ w2.T + b2
    return residual + out


if __name__ == "__main__":
    # Small smoke-test shapes: feature dims lane-aligned (multiples of 128) so matmuls and
    # stores are unmasked/lane-dense; B=64 gives a 2-step batch grid (bm=32).
    B, in_dim, out_dim = 64, 128, 128

    key = jax.random.PRNGKey(0)
    k1, k2, k3, k4, k5, k6, kx = jax.random.split(key, 7)

    # PyTorch-default-style init: U(-1/sqrt(fan_in), 1/sqrt(fan_in)); weights in (out, in) layout.
    bound1 = 1.0 / (in_dim ** 0.5)
    bound2 = 1.0 / (out_dim ** 0.5)
    w1 = jax.random.uniform(k1, (out_dim, in_dim), jnp.float32, -bound1, bound1)
    b1 = jax.random.uniform(k2, (out_dim,), jnp.float32, -bound1, bound1)
    w2 = jax.random.uniform(k3, (out_dim, out_dim), jnp.float32, -bound2, bound2)
    b2 = jax.random.uniform(k4, (out_dim,), jnp.float32, -bound2, bound2)
    gamma = 1.0 + 0.1 * jax.random.normal(k5, (out_dim,), jnp.float32)  # exercise affine path
    beta = 0.1 * jax.random.normal(k6, (out_dim,), jnp.float32)

    x = jax.random.normal(kx, (B, in_dim), jnp.float32)

    # One-time parameter prep (transpose to [K,N], cast bf16, pack affine rows).
    params = prepare_params(w1, b1, w2, b2, gamma, beta)

    y = residual_mlp(x, *params)
    y = jax.block_until_ready(y)

    y_ref = reference(x, w1, b1, w2, b2, gamma, beta)
    assert y.shape == (B, out_dim) and y.dtype == x.dtype
    # bf16 MXU operands (f32 accumulation) vs the pure-f32 reference -> loosened tolerance.
    assert jnp.allclose(y, y_ref, atol=5e-2, rtol=5e-2), "mismatch vs pure-JAX reference"

    print("KERNEL_OK")
</pallas_src>

<mosaic_0001>
module attributes {stable_mosaic.version = 11 : i64} {
  func.func @_copy(%arg0: i32, %arg1: memref<8x128xf32, #tpu.memory_space<vmem>>, %arg2: memref<8x128xf32, #tpu.memory_space<vmem>>) attributes {dimension_semantics = [#tpu.dimension_semantics<arbitrary>], iteration_bounds = array<i64: 1>, scalar_prefetch = 0 : i64, scratch_operands = 0 : i64, tpu.core_type = #tpu.core_type<tc>, window_params = [{pipeline_mode = #tpu.pipeline_mode<synchronous>, transform_indices = @transform_0, window_bounds = array<i64: 8, 128>}, {pipeline_mode = #tpu.pipeline_mode<synchronous>, transform_indices = @transform_1, window_bounds = array<i64: 8, 128>}]} {
    %c0 = arith.constant 0 : index
    %c0_0 = arith.constant 0 : index
    %0 = vector.load %arg1[%c0, %c0_0] : memref<8x128xf32, #tpu.memory_space<vmem>>, vector<8x128xf32>
    %c0_1 = arith.constant 0 : index
    %c0_2 = arith.constant 0 : index
    %1 = vector.load %arg2[%c0_1, %c0_2] : memref<8x128xf32, #tpu.memory_space<vmem>>, vector<8x128xf32>
    tpu.vector_store %arg2[%c0_1, %c0_2], %0 {strides = array<i32>} : memref<8x128xf32, #tpu.memory_space<vmem>>, vector<8x128xf32>,
    return
  }
  func.func @transform_0(%arg0: i32) -> (i32, i32) {
    %c0_i32 = arith.constant 0 : i32
    %c0_i32_0 = arith.constant 0 : i32
    %c0_i32_1 = arith.constant 0 : i32
    return %c0_i32, %c0_i32_0 : i32, i32
  }
  func.func @transform_1(%arg0: i32) -> (i32, i32) {
    %c0_i32 = arith.constant 0 : i32
    %c0_i32_0 = arith.constant 0 : i32
    %c0_i32_1 = arith.constant 0 : i32
    return %c0_i32, %c0_i32_0 : i32, i32
  }
}

module attributes {stable_mosaic.version = 11 : i64} {
  func.func @residual_mlp_kernel(%arg0: i32, %arg1: memref<32x128xf32, #tpu.memory_space<vmem>>, %arg2: memref<128x128xbf16, #tpu.memory_space<vmem>>, %arg3: memref<128x128xbf16, #tpu.memory_space<vmem>>, %arg4: memref<4x128xf32, #tpu.memory_space<vmem>>, %arg5: memref<32x128xf32, #tpu.memory_space<vmem>>) attributes {dimension_semantics = [#tpu.dimension_semantics<parallel>], iteration_bounds = array<i64: 2>, scalar_prefetch = 0 : i64, scratch_operands = 0 : i64, tpu.core_type = #tpu.core_type<tc>, window_params = [{transform_indices = @transform_0, window_bounds = array<i64: 32, 128>}, {pipeline_mode = #tpu.pipeline_mode<synchronous>, transform_indices = @transform_1, window_bounds = array<i64: 128, 128>}, {pipeline_mode = #tpu.pipeline_mode<synchronous>, transform_indices = @transform_2, window_bounds = array<i64: 128, 128>}, {pipeline_mode = #tpu.pipeline_mode<synchronous>, transform_indices = @transform_3, window_bounds = array<i64: 4, 128>}, {transform_indices = @transform_4, window_bounds = array<i64: 32, 128>}]} {
    %c0 = arith.constant 0 : index
    %c0_0 = arith.constant 0 : index
    %0 = vector.load %arg4[%c0, %c0_0] : memref<4x128xf32, #tpu.memory_space<vmem>>, vector<1x128xf32>
    %c1 = arith.constant 1 : index
    %c0_1 = arith.constant 0 : index
    %1 = vector.load %arg4[%c1, %c0_1] : memref<4x128xf32, #tpu.memory_space<vmem>>, vector<1x128xf32>
    %c2 = arith.constant 2 : index
    %c0_2 = arith.constant 0 : index
    %2 = vector.load %arg4[%c2, %c0_2] : memref<4x128xf32, #tpu.memory_space<vmem>>, vector<1x128xf32>
    %c3 = arith.constant 3 : index
    %c0_3 = arith.constant 0 : index
    %3 = vector.load %arg4[%c3, %c0_3] : memref<4x128xf32, #tpu.memory_space<vmem>>, vector<1x128xf32>
    %c0_4 = arith.constant 0 : index
    %c0_5 = arith.constant 0 : index
    %4 = vector.load %arg1[%c0_4, %c0_5] : memref<32x128xf32, #tpu.memory_space<vmem>>, vector<32x128xf32>
    %5 = arith.truncf %4 : vector<32x128xf32> to vector<32x128xbf16>
    %c0_6 = arith.constant 0 : index
    %c0_7 = arith.constant 0 : index
    %6 = vector.load %arg2[%c0_6, %c0_7] : memref<128x128xbf16, #tpu.memory_space<vmem>>, vector<128x128xbf16>
    %cst = arith.constant dense<0.000000e+00> : vector<32x128xf32>
    %7 = tpu.matmul %5, %6, %cst {dimension_numbers = #tpu.dot_dimension_numbers<[1], [0], [0], [1], [0, 0, 1, 1], [], []>} : vector<32x128xbf16>, vector<128x128xbf16>, vector<32x128xf32> -> vector<32x128xf32>
    %8 = vector.broadcast %0 : vector<1x128xf32> to vector<32x128xf32>
    %9 = arith.addf %7, %8 : vector<32x128xf32>
    %cst_8 = arith.constant dense<0.000000e+00> : vector<32xf32>
    %10 = vector.multi_reduction <add>, %9, %cst_8 [1] : vector<32x128xf32> to vector<32xf32>
    %11 = vector.shape_cast %10 : vector<32xf32> to vector<32x1xf32>
    %cst_9 = arith.constant 7.812500e-03 : f32
    %12 = vector.broadcast %cst_9 : f32 to vector<32x1xf32>
    %13 = arith.mulf %11, %12 : vector<32x1xf32>
    %14 = arith.mulf %9, %9 : vector<32x128xf32>
    %cst_10 = arith.constant dense<0.000000e+00> : vector<32xf32>
    %15 = vector.multi_reduction <add>, %14, %cst_10 [1] : vector<32x128xf32> to vector<32xf32>
    %16 = vector.shape_cast %15 : vector<32xf32> to vector<32x1xf32>
    %cst_11 = arith.constant 7.812500e-03 : f32
    %17 = vector.broadcast %cst_11 : f32 to vector<32x1xf32>
    %18 = arith.mulf %16, %17 : vector<32x1xf32>
    %19 = arith.mulf %13, %13 : vector<32x1xf32>
    %20 = arith.subf %18, %19 : vector<32x1xf32>
    %cst_12 = arith.constant 0.000000e+00 : f32
    %21 = vector.broadcast %cst_12 : f32 to vector<32x1xf32>
    %22 = arith.maximumf %20, %21 : vector<32x1xf32>
    %cst_13 = arith.constant 9.99999974E-6 : f32
    %23 = vector.broadcast %cst_13 : f32 to vector<32x1xf32>
    %24 = arith.addf %22, %23 : vector<32x1xf32>
    %25 = math.rsqrt %24 : vector<32x1xf32>
    %26 = vector.broadcast %2 : vector<1x128xf32> to vector<32x128xf32>
    %27 = vector.broadcast %25 : vector<32x1xf32> to vector<32x128xf32>
    %28 = arith.mulf %26, %27 : vector<32x128xf32>
    %29 = vector.broadcast %13 : vector<32x1xf32> to vector<32x128xf32>
    %30 = arith.subf %9, %29 : vector<32x128xf32>
    %31 = arith.mulf %30, %28 : vector<32x128xf32>
    %32 = vector.broadcast %3 : vector<1x128xf32> to vector<32x128xf32>
    %33 = arith.addf %31, %32 : vector<32x128xf32>
    %cst_14 = arith.constant 0.000000e+00 : f32
    %34 = vector.broadcast %cst_14 : f32 to vector<32x128xf32>
    %35 = arith.maximumf %33, %34 : vector<32x128xf32>
    %36 = arith.truncf %35 : vector<32x128xf32> to vector<32x128xbf16>
    %c0_15 = arith.constant 0 : index
    %c0_16 = arith.constant 0 : index
    %37 = vector.load %arg3[%c0_15, %c0_16] : memref<128x128xbf16, #tpu.memory_space<vmem>>, vector<128x128xbf16>
    %cst_17 = arith.constant dense<0.000000e+00> : vector<32x128xf32>
    %38 = tpu.matmul %36, %37, %cst_17 {dimension_numbers = #tpu.dot_dimension_numbers<[1], [0], [0], [1], [0, 0, 1, 1], [], []>} : vector<32x128xbf16>, vector<128x128xbf16>, vector<32x128xf32> -> vector<32x128xf32>
    %39 = vector.broadcast %1 : vector<1x128xf32> to vector<32x128xf32>
    %40 = arith.addf %38, %39 : vector<32x128xf32>
    %41 = arith.addf %9, %40 : vector<32x128xf32>
    %c0_18 = arith.constant 0 : index
    %c0_19 = arith.constant 0 : index
    %42 = vector.load %arg5[%c0_18, %c0_19] : memref<32x128xf32, #tpu.memory_space<vmem>>, vector<32x128xf32>
    tpu.vector_store %arg5[%c0_18, %c0_19], %41 {strides = array<i32>} : memref<32x128xf32, #tpu.memory_space<vmem>>, vector<32x128xf32>,
    return
  }
  func.func @transform_0(%arg0: i32) -> (i32, i32) {
    %c0_i32 = arith.constant 0 : i32
    %c0_i32_0 = arith.constant 0 : i32
    return %arg0, %c0_i32 : i32, i32
  }
  func.func @transform_1(%arg0: i32) -> (i32, i32) {
    %c0_i32 = arith.constant 0 : i32
    %c0_i32_0 = arith.constant 0 : i32
    %c0_i32_1 = arith.constant 0 : i32
    return %c0_i32, %c0_i32_0 : i32, i32
  }
  func.func @transform_2(%arg0: i32) -> (i32, i32) {
    %c0_i32 = arith.constant 0 : i32
    %c0_i32_0 = arith.constant 0 : i32
    %c0_i32_1 = arith.constant 0 : i32
    return %c0_i32, %c0_i32_0 : i32, i32
  }
  func.func @transform_3(%arg0: i32) -> (i32, i32) {
    %c0_i32 = arith.constant 0 : i32
    %c0_i32_0 = arith.constant 0 : i32
    %c0_i32_1 = arith.constant 0 : i32
    return %c0_i32, %c0_i32_0 : i32, i32
  }
  func.func @transform_4(%arg0: i32) -> (i32, i32) {
    %c0_i32 = arith.constant 0 : i32
    %c0_i32_0 = arith.constant 0 : i32
    return %arg0, %c0_i32 : i32, i32
  }
}

</mosaic_0001>

<bundles_post_ra>
// kernel: tpu_custom_call.1
= control target key start
LH: loop header
LB: loop body
LE: loop exit
PB: predicated region body
PF: predicated region fallthrough
CT: control target
= control target key end

     0   :  { %6 = vsyncpa [#allocation3], 0  ;;  %s114_s0 = inlined_call_operand.hbm [shape: f32[8,128], index: 0, kind: input, shape index: {}]   ;;  %s115_s1 = inlined_call_operand.hbm [shape: f32[8,128], index: 1, kind: output, shape index: {}]  }
   0x1   :  { %7 = vsyncpa [#allocation4], 0  ;;  %s13_s8 = sshll.u32 %s114_s0, 4  ;;  %s96_s9 = smov [#allocation2]   ;;  %s14_s8 = int_to_ptr.hbm [resolvable:$true] %s13_s8 }
   0x2   :  { %s15_s10 = sshll.u32 %s96_s9, 4  ;;  %s16_s10 = int_to_ptr.vmem [resolvable:$true] %s15_s10 }
   0x3   :  { %18 = dma.hbm_to_vmem [thread:$0]  %s14_s8, 128, %s16_s10, [#allocation3]  }
   0x4   :  { %92 = dma.done.wait [#allocation3], 128  }
   0x5   :  { %93 = vsyncadd [#allocation3], 4294967168  ;;  %s97_s11 = smov [#allocation5]   ;;  %s32_s15 = sshll.u32 %s115_s1, 4  ;;  %v23_v0 = vld [vmem:[#allocation2] sm:$0xff]  ;;  %s33_s15 = int_to_ptr.hbm [resolvable:$true] %s32_s15 }
   0x6   :  { %s30_s12 = sshll.u32 %s97_s11, 4  ;;  %24 = vst [vmem:[#allocation5] sm:$0xff] %v23_v0  ;;  %s31_s12 = int_to_ptr.vmem [resolvable:$true] %s30_s12 }
   0x7   :  { %35 = dma.vmem_to_hbm [thread:$0]  %s31_s12, 128, %s33_s15, [#allocation4]  }
   0x8   :  { %94 = dma.done.wait [#allocation4], 128  }
   0x9   :  { %95 = vsyncadd [#allocation4], 4294967168 }
   0xa   :  { %40 = vsyncpa [#allocation3], 1 }
   0xb   :  { %41 = vsyncpa [#allocation4], 1 }

// kernel: tpu_custom_call.1
= control target key start
LH: loop header
LB: loop body
LE: loop exit
PB: predicated region body
PF: predicated region fallthrough
CT: control target
= control target key end

     0   :  { %9 = vsyncpa [#allocation3], 0  ;;  %s1341_s0 = inlined_call_operand.hbm [shape: f32[64,128], index: 0, kind: input, shape index: {}]   ;;  %s1342_s1 = inlined_call_operand.hbm [shape: bf16[128,128], index: 1, kind: input, shape index: {}]   ;;  %s1343_s2 = inlined_call_operand.hbm [shape: bf16[128,128], index: 2, kind: input, shape index: {}]   ;;  %s1344_s3 = inlined_call_operand.hbm [shape: f32[4,128], index: 3, kind: input, shape index: {}]   ;;  %s1345_s4 = inlined_call_operand.hbm [shape: f32[64,128], index: 4, kind: output, shape index: {}]  }
   0x1   :  { %11 = vsyncpa [#allocation3 + $0x1], 0 }
   0x2   :  { %12 = vsyncpa [#allocation6], 0 }
   0x3   :  { %13 = vsyncpa [#allocation9], 0 }
   0x4   :  { %14 = vsyncpa [#allocation4], 0 }
   0x5   :  { %16 = vsyncpa [#allocation4 + $0x1], 0  ;;  %s1123_s15 = smov 0   ;;  %s1125_s16 = smov 0  }
   0x6   :  { %s1127_s17 = smov 0   ;;  %s1129_s18 = smov 0  }
   0x7 LB: > { %s1144_s19 = sadd.s32 4294967295, %s1087_s18   ;;  %s680_s20 = sadd.s32 4294967294, %s1087_s18   ;;  %s1087_s18 = sphi %s1129_s18, %s1356_s18   ;;  %s1083_s17 = sphi %s1127_s17, %s1355_s17   ;;  %s1079_s16 = sphi %s1125_s16, %s1354_s16   ;;  %s1075_s15 = sphi %s1123_s15, %s1353_s15  }
   0x8   : > { %p42_p0 = scmp.ne.s32.totalorder %s1079_s16, %s1075_s15  ;;  %p43_p1 = scmp.eq.s32.totalorder %s1144_s19, 0 }
   0x9   : > { %p129_p2 = scmp.eq.s32.totalorder %s1144_s19, 1  ;;  %p135_p3 = scmp.eq.s32.totalorder %s680_s20, 1 }
   0xa   : > { %p1153_p4 = por %p43_p1, %p42_p0  ;;  %p681_p5 = scmp.ge.s32.totalorder %s1087_s18, 1 }
   0xb   : > { %p1158_p6 = por %p135_p3, %p42_p0  ;;  %p142_p7 = scmp.lt.s32.totalorder %s1087_s18, 3 }
   0xc   : > { %s153_s25 = sshll.u32 %s1342_s1, 4  ;;  %s1089_s27 = smov [#allocation5]   ;;  %s154_s25 = int_to_ptr.hbm [resolvable:$true] %s153_s25 }
   0xd   : > { %p1166_p8 = pnand %p681_p5, %p142_p7  ;;  %s155_s28 = sshll.u32 %s1089_s27, 4  ;;  %s156_s28 = int_to_ptr.vmem [resolvable:$true] %s155_s28 }
   0xe   : > { %s167_s6 = sshll.u32 %s1343_s2, 4  ;;  %s1090_s7 = smov 64   ;;  %s168_s6 = int_to_ptr.hbm [resolvable:$true] %s167_s6 }
   0xf   : > { %p814_p9 = pneg %p1166_p8  ;;  %s1091_s8 = smov 4  }
  0x10   : > { %s1092_s9 = smov [#allocation7]   ;;  %s182_s13 = sshll.u32 %s1344_s3, 4  ;;  %s183_s13 = int_to_ptr.hbm [resolvable:$true] %s182_s13 }
  0x11   : > { %p1174_p10 = pnand %p814_p9, %p43_p1  ;;  %s169_s10 = sshll.u32 %s1092_s9, 4  ;;  %s170_s10 = int_to_ptr.vmem [resolvable:$true] %s169_s10 }
  0x12   : > { %s1093_s14 = smov [#allocation8]   ;;  %s1190_s23 = sadd.s32 1, %s1087_s18  }
  0x13   : > { %817 = dma.hbm_to_vmem [thread:$0]  (!%p1174_p10), %s154_s25, 1024, %s156_s28, [#allocation6], %s1090_s7, %s1090_s7, %s1091_s8  }
  0x14   : > { %820 = dma.hbm_to_vmem [thread:$0]  (!%p1174_p10), %s168_s6, 1024, %s170_s10, [#allocation6], %s1090_s7, %s1090_s7, %s1091_s8  }
  0x15   : > { %s184_s20 = sshll.u32 %s1093_s14, 4  ;;  %s26_s24 = ssub.s32 %s1087_s18, %s1190_s23  ;;  %s185_s20 = int_to_ptr.vmem [resolvable:$true] %s184_s20 }
  0x16   : > { %823 = dma.hbm_to_vmem [thread:$0]  (!%p1174_p10), %s183_s13, 64, %s185_s20, [#allocation9]  }
  0x17   : > { %s29_s25 = sadd.s32 1, %s1083_s17  ;;  %p27_p12 = scmp.eq.s32.totalorder %s26_s24, 0 }
  0x18   : > { %p36_p13 = scmp.ne.s32.totalorder %s1083_s17, %s1079_s16  ;;  %p37_p0 = scmp.eq.s32.totalorder %s1087_s18, 0 }
  0x19   : > { %p835_p3 = scmp.lt.s32.totalorder %s1087_s18, 2  ;;  %s195_s30 = sand.u32 1, %s1083_s17  }
  0x1a   : > { %s1202_s27 = scalar_select %p27_p12, %s1083_s17, %s29_s25  }
  0x1b   : > { %p38_p5 = por %p37_p0, %p36_p13  ;;  %p1206_p7 = por %p129_p2, %p36_p13 }
  0x1c   : > { %s764_s5 = sshll.u32 %s1087_s18, 5  ;;  %s686_s29 = sshll.u32 %s195_s30, 5 }
  0x1d   : > { %s204_s8 = scalar_lea.hbm %s1341_s0, %s764_s5  ;;  %s199_s10 = scalar_lea.vmem [#allocation2], %s686_s29 }
  0x1e   : > { %s205_s9 = sshll.u32 %s204_s8, 4  ;;  %s207_s11 = sshll.u32 %s199_s10, 4  ;;  %s206_s9 = int_to_ptr.hbm [resolvable:$true] %s205_s9  ;;  %s208_s11 = int_to_ptr.vmem [resolvable:$true] %s207_s11 }
  0x1f   : > { %p1217_p9 = pnand %p835_p3, %p38_p5  ;;  %s196_s13 = scalar_lea.sflag [#allocation3], %s195_s30 }
  0x20   : > { %s983_s14 = sshra.s32 %s206_s9, 4  ;;  %s990_s5 = scalar_lea.hbm %s1341_s0, 64  ;;  %s984_s14 = int_to_ptr.hbm [resolvable:$true] %s983_s14 }
  0x21   : > { %s985_s20 = scalar_lea.hbm %s984_s14, 32  ;;  %p987_p10 = pneg %p1217_p9 }
  0x22   : > { %p986_p2 = scmp.ne.s32.totalorder %s984_s14, %s985_s20  ;;  %p991_p0 = scmp.lt.s32.totalorder %s984_s14, %s1341_s0 }
  0x23   : > { %p992_p3 = scmp.lt.s32.totalorder %s990_s5, %s985_s20 }
  0x24   : > { %p988_p12 = pnand %p987_p10, %p986_p2 }
  0x25   : > { %p993_p5 = por %p992_p3, %p991_p0 }
  0x26   : > { %p989_p13 = pneg %p988_p12 }
  0x28   : > { %p994_p11 = pnand %p993_p5, %p989_p13 }
  0x2a   : > { %997 = shalt.err (!%p994_p11)
}
  0x2b   : > { %s1094_s30 = smov 128   ;;  %s1095_s7 = smov 8  }
  0x2c   : > { %827 = dma.hbm_to_vmem [thread:$0]  (!%p1217_p9), %s206_s9, 512, %s208_s11, %s196_s13, %s1094_s30, %s1094_s30, %s1095_s7  }
  0x2d   : > { %219 = sbr.rel (%p1166_p8) target bundleno = 533 (0x215), region = 36  ;;  %s1234_s8 = sand.u32 (!%p1166_p8), 1, %s1079_s16  }
  0x2e   : > { %s690_s10 = sshll.u32 (!%p1166_p8), %s1234_s8, 5  ;;  %s222_s14 = scalar_lea.sflag (!%p1166_p8), [#allocation3], %s1234_s8 }
  0x2f   : > { %s1240_s20 = scalar_lea.vmem (!%p1166_p8), [#allocation2], %s690_s10 }
  0x32   : > { %1058 = dma.done.wait (%p1153_p4), %s222_s14, 512  }
  0x33   : > { %1060 = vsyncadd (%p1153_p4), %s222_s14, 4294966784 }
  0x34   : > { %1062 = dma.done.wait (%p43_p1), [#allocation6], 2048  }
  0x35   : > { %1064 = vsyncadd (%p43_p1), [#allocation6], 4294965248 }
  0x36   : > { %1066 = dma.done.wait (%p43_p1), [#allocation9], 64  }
  0x37   : > { %1068 = vsyncadd (%p43_p1), [#allocation9], 4294967232  ;;  %v772_v0 = vld [vmem:[#allocation5 + $0x38] sm:$0xff]  ;;  %v771_v1 = vld [vmem:[#allocation5 + $0x30] sm:$0xff]  ;;  %s781_s21 = sshll.u32 %s1144_s19, 5  ;;  %s265_s26 = scalar_lea.vmem [#allocation10], %s690_s10 }
  0x38   : > { %343 = vmatpush.bf16.msra.mxu0 %v772_v0  ;;  %782 = vmatpush.bf16.msra.mxu2 %v772_v0  ;;  %v770_v2 = vld [vmem:[#allocation5 + $0x28] sm:$0xff]  ;;  %v769_v3 = vld [vmem:[#allocation5 + $0x20] sm:$0xff]  ;;  %v768_v4 = vld [vmem:[#allocation5 + $0x18] sm:$0xff]  ;;  %s574_s12 = scalar_lea.hbm %s1345_s4, %s781_s21  ;;  %s575_s13 = sshll.u32 %s265_s26, 4  ;;  %s576_s13 = int_to_ptr.vmem [resolvable:$true] %s575_s13 }
  0x39   : > { %v767_v5 = vld [vmem:[#allocation5 + $0x10] sm:$0xff]  ;;  %v766_v6 = vld [vmem:[#allocation5 + $0x8] sm:$0xff]  ;;  %v765_v7 = vld [vmem:[#allocation5] sm:$0xff]  ;;  %s577_s24 = sshll.u32 %s574_s12, 4  ;;  %s563_s19 = scalar_lea.sflag [#allocation4], %s1234_s8  ;;  %s578_s24 = int_to_ptr.hbm [resolvable:$true] %s577_s24 }
  0x3a   : > { %v272_v8 = vld [vmem:[%s1240_s20] sm:$0xff]  ;;  %v273_v9 = vld [vmem:[%s1240_s20 + $0x8] sm:$0xff]  ;;  %v274_v10 = vld [vmem:[%s1240_s20 + $0x10] sm:$0xff]  ;;  %s1027_s25 = sshra.s32 %s578_s24, 4  ;;  %s1033_s30 = scalar_lea.hbm %s1345_s4, 64  ;;  %s1028_s25 = int_to_ptr.hbm [resolvable:$true] %s1027_s25 }
  0x3b   : > { %v275_v11 = vld [vmem:[%s1240_s20 + $0x18] sm:$0xff]  ;;  %v276_v12 = vpack.c.bf16 %v273_v9, %v272_v8  ;;  %v881_v14 = vld [vmem:[#allocation8] ss:$0 sm:$0xff]  ;;  %v779_v28 = vld [vmem:[#allocation7 + $0x30] sm:$0xff]  ;;  %s1029_s5 = scalar_lea.hbm %s1028_s25, 32  ;;  %p1034_p11 = scmp.lt.s32.totalorder %s1028_s25, %s1345_s4 }
  0x3c   : > { %344 = vmatpush.bf16.msra.mxu0 %v771_v1  ;;  %783 = vmatpush.bf16.msra.mxu2 %v771_v1  ;;  %v277_v13 = vpack.c.bf16 %v275_v11, %v274_v10  ;;  %v780_v27 = vld [vmem:[#allocation7 + $0x38] sm:$0xff]  ;;  %v778_v29 = vld [vmem:[#allocation7 + $0x28] sm:$0xff]  ;;  %v777_v30 = vld [vmem:[#allocation7 + $0x20] sm:$0xff]  ;;  %p1030_p1 = scmp.ne.s32.totalorder %s1028_s25, %s1029_s5  ;;  %p1035_p9 = scmp.lt.s32.totalorder %s1033_s30, %s1029_s5 }
  0x3d   : > { %790 = vmatpush.bf16.msra.mxu3 %v780_v27  ;;  %535 = vmatpush.bf16.msra.mxu1 %v780_v27  ;;  %v776_v31 = vld [vmem:[#allocation7 + $0x18] sm:$0xff]  ;;  %v775_v37 = vld [vmem:[#allocation7 + $0x10] sm:$0xff]  ;;  %v774_v41 = vld [vmem:[#allocation7 + $0x8] sm:$0xff] }
  0x3e   : > { %v773_v46 = vld [vmem:[#allocation7] sm:$0xff]  ;;  %p1031_p4 = pnand %p1030_p1, %p1206_p7  ;;  %p1036_p2 = por %p1035_p9, %p1034_p11 }
  0x3f   : > { %v882_v11 = vld [vmem:[#allocation8 + $0x2] ss:$0 sm:$0xff] }
  0x40   : > { %345 = vmatpush.bf16.msra.mxu0 %v770_v2  ;;  %784 = vmatpush.bf16.msra.mxu2 %v770_v2  ;;  %p1032_p8 = pneg %p1031_p4 }
  0x41   : > { %791 = vmatpush.bf16.msra.mxu3 %v779_v28  ;;  %536 = vmatpush.bf16.msra.mxu1 %v779_v28 }
  0x42   : > { %p1037_p10 = pnand %p1036_p2, %p1032_p8 }
  0x44   : > { %346 = vmatpush.bf16.msra.mxu0 %v769_v3  ;;  %785 = vmatpush.bf16.msra.mxu2 %v769_v3 }
  0x45   : > { %792 = vmatpush.bf16.msra.mxu3 %v778_v29  ;;  %537 = vmatpush.bf16.msra.mxu1 %v778_v29  ;;  %v883_v29 = vld [vmem:[#allocation8 + $0x3] ss:$0 sm:$0xff] }
  0x48   : > { %347 = vmatpush.bf16.msra.mxu0 %v768_v4  ;;  %786 = vmatpush.bf16.msra.mxu2 %v768_v4 }
  0x49   : > { %793 = vmatpush.bf16.msra.mxu3 %v777_v30  ;;  %538 = vmatpush.bf16.msra.mxu1 %v777_v30 }
  0x4c   : > { %348 = vmatpush.bf16.msra.mxu0 %v767_v5  ;;  %787 = vmatpush.bf16.msra.mxu2 %v767_v5 }
  0x4d   : > { %794 = vmatpush.bf16.msra.mxu3 %v776_v31  ;;  %539 = vmatpush.bf16.msra.mxu1 %v776_v31 }
  0x50   : > { %349 = vmatpush.bf16.msra.mxu0 %v766_v6  ;;  %788 = vmatpush.bf16.msra.mxu2 %v766_v6 }
  0x51   : > { %795 = vmatpush.bf16.msra.mxu3 %v775_v37  ;;  %540 = vmatpush.bf16.msra.mxu1 %v775_v37 }
  0x54   : > { %350 = vmatpush.bf16.msra.mxu0 %v765_v7  ;;  %789 = vmatpush.bf16.msra.mxu2 %v765_v7 }
  0x55   : > { %796 = vmatpush.bf16.msra.mxu3 %v774_v41  ;;  %541 = vmatpush.bf16.msra.mxu1 %v774_v41 }
  0x57   : > { %351 = vmatmul.bf16.vlgmr.msra.gmra.mxu0 %v276_v12  ;;  %356 = vmatmul.bf16.vlgmr.msra.gmra.mxu2 %v277_v13 }
  0x59   : > { %797 = vmatpush.bf16.msra.mxu3 %v773_v46  ;;  %542 = vmatpush.bf16.msra.mxu1 %v773_v46 }
  0xd4   : > { %v352_v15 = vpop.f32.mrf.mxu0 }
  0xd5   : > { %v1258_v16 = vadd.f32 %v881_v14, %v352_v15 }
  0xd7   : > { %362 = vadd.xlane.f32.xlu2 %v1258_v16  ;;  %v374_v25 = vmul.f32 %v1258_v16, %v1258_v16 }
  0xda   : > { %v357_v17 = vpop.f32.mrf.mxu2 }
  0xdb   : > { %v1261_v18 = vadd.f32 %v881_v14, %v357_v17 }
  0xdc   : > { %v354_v19 = vpop.f32.mrf.mxu0 }
  0xdd   : > { %v1263_v20 = vadd.f32 %v881_v14, %v354_v19  ;;  %366 = vadd.xlane.f32.xlu0 %v1261_v18  ;;  %v376_v21 = vmul.f32 %v1261_v18, %v1261_v18 }
  0xdf   : > { %382 = vadd.xlane.f32.xlu1 %v376_v21  ;;  %364 = vadd.xlane.f32.xlu2 %v1263_v20  ;;  %v375_v26 = vmul.f32 %v1263_v20, %v1263_v20 }
  0xe2   : > { %v359_v22 = vpop.f32.mrf.mxu2 }
  0xe3   : > { %v1269_v23 = vadd.f32 %v881_v14, %v359_v22 }
  0xe5   : > { %368 = vadd.xlane.f32.xlu0 %v1269_v23  ;;  %v377_v24 = vmul.f32 %v1269_v23, %v1269_v23 }
  0xe7   : > { %384 = vadd.xlane.f32.xlu1 %v377_v24 }
  0xed   : > { %378 = vadd.xlane.f32.xlu0 %v374_v25 }
  0xef   : > { %380 = vadd.xlane.f32.xlu1 %v375_v26 }
 0x14a   : > { %v363_v38 = vpop.xlane.xlu2 %362 }
 0x14b   : > { %v1286_v51 = vmul.f32 0.0078125, %v363_v38 }
 0x14d   : > { %v390_v55 = vmul.f32 %v1286_v51, %v1286_v51 }
 0x150   : > { %v367_v32 = vpop.xlane.xlu0 %366 }
 0x151   : > { %v1278_v33 = vmul.f32 0.0078125, %v367_v32 }
 0x152   : > { %v383_v34 = vpop.xlane.xlu1 %382  ;;  %v365_v49 = vpop.xlane.xlu2 %364 }
 0x153   : > { %v392_v35 = vmul.f32 %v1278_v33, %v1278_v33  ;;  %v388_v36 = vmul.f32 0.0078125, %v383_v34  ;;  %v1290_v56 = vmul.f32 0.0078125, %v365_v49  ;;  %v453_v22 = vsub.f32 %v1261_v18, %v1278_v33 }
 0x155   : > { %v396_v39 = vsub.f32 %v388_v36, %v392_v35  ;;  %v391_v61 = vmul.f32 %v1290_v56, %v1290_v56  ;;  %v452_v49 = vsub.f32 %v1263_v20, %v1290_v56 }
 0x157   : > { %v400_v40 = vmax.f32 %v396_v39, 0.0 }
 0x158   : > { %v369_v42 = vpop.xlane.xlu0 %368 }
 0x159   : > { %v404_v43 = vadd.f32 1e-05, %v400_v40  ;;  %v1282_v44 = vmul.f32 0.0078125, %v369_v42 }
 0x15a   : > { %v385_v45 = vpop.xlane.xlu1 %384 }
 0x15b   : > { %885 = vrsqrt.f32 %v404_v43  ;;  %v393_v47 = vmul.f32 %v1282_v44, %v1282_v44  ;;  %v389_v48 = vmul.f32 0.0078125, %v385_v45  ;;  %vm432_vm1 = vweird.f32 %v404_v43 }
 0x15c   : > { %v454_v32 = vsub.f32 %v1269_v23, %v1282_v44  ;;  %v451_v45 = vsub.f32 %v1258_v16, %v1286_v51 }
 0x15d   : > { %v397_v50 = vsub.f32 %v389_v48, %v393_v47 }
 0x15f   : > { %v401_v52 = vmax.f32 %v397_v50, 0.0 }
 0x160   : > { %v379_v53 = vpop.xlane.xlu0 %378 }
 0x161   : > { %v886_v54 = vpop.eup %885  ;;  %v386_v57 = vmul.f32 0.0078125, %v379_v53  ;;  %v405_v59 = vadd.f32 1e-05, %v401_v52 }
 0x162   : > { %v427_v58 = vmul.f32 %v886_v54, %v404_v43  ;;  %v381_v60 = vpop.xlane.xlu1 %380  ;;  %vm433_vm0 = vweird.f32 %v886_v54 }
 0x163   : > { %v394_v62 = vsub.f32 %v386_v57, %v390_v55  ;;  %v387_v63 = vmul.f32 0.0078125, %v381_v60  ;;  %887 = vrsqrt.f32 %v405_v59  ;;  %vm434_vm2 = vmor %vm432_vm1, %vm433_vm0  ;;  %vm442_vm4 = vweird.f32 %v405_v59  ;;  %v884_v60 = vld [vmem:[#allocation8 + $0x1] ss:$0 sm:$0xff] }
 0x164   : > { %v428_v0 = vmul.f32 %v886_v54, %v427_v58 }
 0x165   : > { %v398_v1 = vmax.f32 %v394_v62, 0.0  ;;  %v395_v2 = vsub.f32 %v387_v63, %v391_v61 }
 0x166   : > { %v429_v3 = vmul.f32 0.5, %v428_v0 }
 0x167   : > { %v402_v4 = vadd.f32 1e-05, %v398_v1  ;;  %v399_v5 = vmax.f32 %v395_v2, 0.0 }
 0x168   : > { %v430_v6 = vsub.f32 1.5, %v429_v3 }
 0x169   : > { %889 = vrsqrt.f32 %v402_v4  ;;  %v403_v7 = vadd.f32 1e-05, %v399_v5  ;;  %v888_v8 = vpop.eup %887  ;;  %vm412_vm7 = vweird.f32 %v402_v4 }
 0x16a   : > { %v431_v9 = vmul.f32 %v886_v54, %v430_v6  ;;  %v437_v10 = vmul.f32 %v888_v8, %v405_v59  ;;  %vm443_vm3 = vweird.f32 %v888_v8 }
 0x16b   : > { %891 = vrsqrt.f32 %v403_v7  ;;  %vm444_vm5 = vmor %vm442_vm4, %vm443_vm3  ;;  %vm422_vm10 = vweird.f32 %v403_v7 }
 0x16c   : > { %v435_v12 = vsel %vm434_vm2, %v886_v54, %v431_v9  ;;  %v438_v13 = vmul.f32 %v888_v8, %v437_v10 }
 0x16d   : > { %v449_v17 = vmul.f32 %v882_v11, %v435_v12 }
 0x16e   : > { %v439_v15 = vmul.f32 0.5, %v438_v13 }
 0x16f   : > { %v890_v14 = vpop.eup %889  ;;  %v457_v28 = vmul.f32 %v453_v22, %v449_v17 }
 0x170   : > { %v407_v19 = vmul.f32 %v890_v14, %v402_v4  ;;  %v440_v24 = vsub.f32 1.5, %v439_v15  ;;  %vm413_vm6 = vweird.f32 %v890_v14 }
 0x171   : > { %v892_v21 = vpop.eup %891  ;;  %v462_v33 = vadd.f32 %v883_v29, %v457_v28  ;;  %vm414_vm9 = vmor %vm412_vm7, %vm413_vm6 }
 0x172   : > { %v408_v25 = vmul.f32 %v890_v14, %v407_v19  ;;  %v417_v26 = vmul.f32 %v892_v21, %v403_v7  ;;  %v441_v27 = vmul.f32 %v888_v8, %v440_v24  ;;  %vm423_vm8 = vweird.f32 %v892_v21 }
 0x173   : > { %vm424_vm11 = vmor %vm422_vm10, %vm423_vm8  ;;  %v466_v46 = vmax.f32 %v462_v33, 0.0 }
 0x174   : > { %v409_v30 = vmul.f32 0.5, %v408_v25  ;;  %v418_v31 = vmul.f32 %v892_v21, %v417_v26  ;;  %v445_v34 = vsel %vm444_vm5, %v888_v8, %v441_v27 }
 0x175   : > { %v450_v37 = vmul.f32 %v882_v11, %v445_v34 }
 0x176   : > { %v410_v35 = vsub.f32 1.5, %v409_v30  ;;  %v419_v36 = vmul.f32 0.5, %v418_v31 }
 0x177   : > { %v458_v40 = vmul.f32 %v454_v32, %v450_v37 }
 0x178   : > { %v411_v38 = vmul.f32 %v890_v14, %v410_v35  ;;  %v420_v39 = vsub.f32 1.5, %v419_v36 }
 0x179   : > { %v463_v42 = vadd.f32 %v883_v29, %v458_v40 }
 0x17a   : > { %v421_v41 = vmul.f32 %v892_v21, %v420_v39  ;;  %v415_v43 = vsel %vm414_vm9, %v890_v14, %v411_v38 }
 0x17b   : > { %v447_v44 = vmul.f32 %v882_v11, %v415_v43  ;;  %v467_v47 = vmax.f32 %v463_v42, 0.0 }
 0x17c   : > { %v425_v48 = vsel %vm424_vm11, %v892_v21, %v421_v41 }
 0x17d   : > { %v448_v50 = vmul.f32 %v882_v11, %v425_v48  ;;  %v455_v52 = vmul.f32 %v451_v45, %v447_v44  ;;  %v469_v53 = vpack.c.bf16 %v467_v47, %v466_v46 }
 0x17f   : > { %v456_v54 = vmul.f32 %v452_v49, %v448_v50  ;;  %v460_v55 = vadd.f32 %v883_v29, %v455_v52  ;;  %548 = vmatmul.bf16.vlgmr.msra.gmra.mxu3 %v469_v53 }
 0x181   : > { %v461_v57 = vadd.f32 %v883_v29, %v456_v54  ;;  %v464_v58 = vmax.f32 %v460_v55, 0.0 }
 0x183   : > { %v465_v59 = vmax.f32 %v461_v57, 0.0 }
 0x185   : > { %v468_v51 = vpack.c.bf16 %v465_v59, %v464_v58 }
 0x187   : > { %543 = vmatmul.bf16.vlgmr.msra.gmra.mxu1 %v468_v51 }
 0x202   : > { %v549_v61 = vpop.f32.mrf.mxu3 }
 0x203   : > { %v550_v62 = vadd.f32 %v884_v60, %v549_v61 }
 0x204   : > { %v544_v63 = vpop.f32.mrf.mxu1 }
 0x205   : > { %v545_v0 = vadd.f32 %v884_v60, %v544_v63  ;;  %v556_v56 = vadd.f32 %v550_v62, %v1261_v18 }
 0x207   : > { %v554_v1 = vadd.f32 %v545_v0, %v1258_v16  ;;  %560 = vst [vmem:[%s265_s26 + $0x10] sm:$0xff] %v556_v56 }
 0x209   : > { %558 = vst [vmem:[%s265_s26] sm:$0xff] %v554_v1 }
 0x20a   : > { %v551_v2 = vpop.f32.mrf.mxu3 }
 0x20b   : > { %v552_v3 = vadd.f32 %v884_v60, %v551_v2 }
 0x20c   : > { %v546_v4 = vpop.f32.mrf.mxu1 }
 0x20d   : > { %v547_v5 = vadd.f32 %v884_v60, %v546_v4  ;;  %v557_v18 = vadd.f32 %v552_v3, %v1269_v23 }
 0x20f   : > { %v555_v16 = vadd.f32 %v547_v5, %v1263_v20  ;;  %561 = vst [vmem:[%s265_s26 + $0x18] sm:$0xff] %v557_v18 }
 0x211   : > { %559 = vst [vmem:[%s265_s26 + $0x8] sm:$0xff] %v555_v16 }
 0x212   : > { %1040 = shalt.err (!%p1037_p10)
}
 0x213   : > { %s1096_s8 = smov 128   ;;  %s1097_s14 = smov 8  }
 0x214   : > { %812 = dma.vmem_to_hbm [thread:$0]  (%p1206_p7), %s576_s13, 512, %s578_s24, %s563_s19, %s1096_s8, %s1096_s8, %s1097_s14  }
 0x215 PF: > { %s592_s20 = sand.u32 1, %s1075_s15   ;;  %p1352_p12 = scmp.ge.s32.totalorder %s1087_s18, 2 }
 0x216   : > { %s593_s21 = scalar_lea.sflag [#allocation4], %s592_s20 }
 0x217   : > { %p829_p13 = pnand %p1352_p12, %p1158_p6 }
 0x219   : > { %p830_p0 = pneg %p829_p13 }
 0x21b   : > { %1070 = dma.done.wait (%p830_p0), %s593_s21, 512  }
 0x21c   : > { %1072 = vsyncadd (%p830_p0), %s593_s21, 4294966784  ;;  %p19_p3 = scmp.ge.s32.totalorder %s1190_s23, 4   ;;  %s1353_s15 = smov %s1079_s16 }
 0x21d   : > { %s1354_s16 = smov %s1083_s17  ;;  %s1355_s17 = smov %s1202_s27 }
 0x21e   : > { %s1356_s18 = smov %s1190_s23  ;;  %21 = sbr.rel (!%p19_p3) target bundleno = 7 (0x7), region = 93 }
 0x223   :  { %599 = vsyncpa [#allocation3], 1 }
 0x224   :  { %601 = vsyncpa [#allocation3 + $0x1], 1 }
 0x225   :  { %602 = vsyncpa [#allocation6], 1 }
 0x226   :  { %603 = vsyncpa [#allocation9], 1 }
 0x227   :  { %604 = vsyncpa [#allocation4], 1 }
 0x228   :  { %606 = vsyncpa [#allocation4 + $0x1], 1 }

</bundles_post_ra>
